<compile_context>
chip_gen: v7x
topology: tpu7x:2x2x1
jax: 0.10.0
libtpu: 0.0.40
codegen_flags: <defaults>
</compile_context>

<pallas_src>
import jax
import jax.numpy as jnp
from jax.experimental import pallas as pl
from jax.experimental.pallas import tpu as pltpu


# ---------------------------------------------------------------------------
# Generic fused "affine+ReLU -> 1x1 conv (matmul) -> affine+ReLU -> +residual"
# ---------------------------------------------------------------------------

def _make_conv1x1_kernel(pre_act: bool, post_act: bool, add_res: bool):
    """Builds a kernel:  out = post( W @ pre(x) + b ) [+ res]  on (C, spatial) tiles."""

    def kernel(*refs):
        i = 0
        x_ref, w_ref, b_ref = refs[0], refs[1], refs[2]
        i = 3
        if pre_act:
            ps_ref, pt_ref = refs[i], refs[i + 1]
            i += 2
        if post_act:
            qs_ref, qt_ref = refs[i], refs[i + 1]
            i += 2
        if add_res:
            r_ref = refs[i]
            i += 1
        o_ref = refs[i]

        x = x_ref[...].astype(jnp.float32)                     # (Ci, ts)
        if pre_act:                                            # fused BN + ReLU (per in-channel)
            x = jnp.maximum(x * ps_ref[...] + pt_ref[...], 0.0)
        # MXU matmul: (Co, Ci) @ (Ci, ts) -> (Co, ts); spatial stays lane-dense.
        acc = jnp.dot(w_ref[...], x, preferred_element_type=jnp.float32)
        acc = acc + b_ref[...]                                 # bias, pre-cast to f32 in wrapper
        if post_act:                                           # fused BN + ReLU (per out-channel)
            acc = jnp.maximum(acc * qs_ref[...] + qt_ref[...], 0.0)
        if add_res:                                            # fused residual add
            acc = acc + r_ref[...].astype(jnp.float32)
        o_ref[...] = acc.astype(o_ref.dtype)

    return kernel


def _spatial_tile(S, N, Ci, Co, itemsize):
    """Pick the spatial (lane) tile: a multiple of 128 dividing S, as large as the
    VMEM budget allows, while keeping enough grid steps for v7x's 2 TensorCores."""
    if S % 128 != 0:
        return S                                   # full dim (allowed by the (8,128) rule)
    budget = 24 * 1024 * 1024                      # headroom under v7x's 64 MiB VMEM
    per_lane = 2 * (Ci + 2 * Co) * itemsize        # 2x: double-buffered x / out / res tiles
    cap = max(128, budget // max(per_lane, 1))
    candidates = [t for t in (128, 256, 512, 1024, 2048, 4096)
                  if S % t == 0 and t <= cap]
    if not candidates:
        return 128
    for min_steps in (4, 2, 1):                    # prefer >= 4 parallel steps (v7x 2 TCs)
        for t in reversed(candidates):             # ...but as big a tile as possible
            if N * (S // t) >= min_steps:
                return t
    return candidates[0]


def _conv1x1(x, w2d, b, *, pre=None, post=None, res=None):
    """Fused channel matmul on NCHW-native, spatially flattened activations.

    x    : [N, Ci, S]     (S = H*W on the lane axis)
    w2d  : [Co, Ci]
    b    : [Co]
    pre  : optional (scale[Ci], shift[Ci])  -> relu(scale*x + shift) before the matmul
    post : optional (scale[Co], shift[Co])  -> relu(scale*y + shift) after bias
    res  : optional [N, Co, S] residual added at the very end
    returns [N, Co, S]
    """
    N, Ci, S = x.shape
    Co = w2d.shape[0]
    f32 = jnp.float32

    ts = _spatial_tile(S, N, Ci, Co, x.dtype.itemsize)
    grid = (N, S // ts)

    # Params are folded/cast to f32 once here (not per grid step inside the kernel).
    operands = [x, w2d.astype(f32), b.astype(f32).reshape(Co, 1)]
    in_specs = [
        pl.BlockSpec((None, Ci, ts), lambda n, s: (n, 0, s)),   # activation tile (lane-dense)
        # Constant index maps: weight / bias / BN vectors are DMA'd once and stay
        # resident in VMEM for the whole grid.
        pl.BlockSpec((Co, Ci), lambda n, s: (0, 0)),
        pl.BlockSpec((Co, 1), lambda n, s: (0, 0)),
    ]
    if pre is not None:
        ps, pt = pre
        operands += [ps.astype(f32).reshape(Ci, 1), pt.astype(f32).reshape(Ci, 1)]
        in_specs += [pl.BlockSpec((Ci, 1), lambda n, s: (0, 0))] * 2
    if post is not None:
        qs, qt = post
        operands += [qs.astype(f32).reshape(Co, 1), qt.astype(f32).reshape(Co, 1)]
        in_specs += [pl.BlockSpec((Co, 1), lambda n, s: (0, 0))] * 2
    if res is not None:
        operands.append(res)
        in_specs.append(pl.BlockSpec((None, Co, ts), lambda n, s: (n, 0, s)))

    flops = 2 * N * S * Ci * Co
    bytes_accessed = int(sum(int(op.size) * op.dtype.itemsize for op in operands)
                         + N * Co * S * x.dtype.itemsize)

    kernel = _make_conv1x1_kernel(pre is not None, post is not None, res is not None)

    return pl.pallas_call(
        kernel,
        out_shape=jax.ShapeDtypeStruct((N, Co, S), x.dtype),
        grid=grid,
        in_specs=in_specs,
        out_specs=pl.BlockSpec((None, Co, ts), lambda n, s: (n, 0, s)),
        compiler_params=pltpu.CompilerParams(
            dimension_semantics=("parallel", "parallel"),
            vmem_limit_bytes=48 * 1024 * 1024,       # explicit; fits v7x (64 MiB) with headroom
        ),
        cost_estimate=pl.CostEstimate(
            flops=flops, transcendentals=0, bytes_accessed=bytes_accessed),
    )(*operands)


# ---------------------------------------------------------------------------
# Residual block wrapper (all glue is free reshapes / tiny tensors, no transposes)
# ---------------------------------------------------------------------------

def _bn_fold(bn, eps):
    """Inference-mode BatchNorm folded into per-channel scale/shift."""
    scale = bn["gamma"] / jnp.sqrt(bn["var"] + eps)
    shift = bn["beta"] - bn["mean"] * scale
    return scale, shift


def _im2col_3x3(x_flat, H, W):
    """[N, C, H*W] -> [N, 9*C, H*W] of zero-padded 3x3 taps.

    Channel ordering is (kh*3 + kw)*C + c, matching
    weight.transpose(0, 2, 3, 1).reshape(Co, 9*C).
    """
    N, C, _ = x_flat.shape
    xp = jnp.pad(x_flat.reshape(N, C, H, W), ((0, 0), (0, 0), (1, 1), (1, 1)))
    taps = [xp[:, :, kh:kh + H, kw:kw + W] for kh in range(3) for kw in range(3)]
    return jnp.concatenate(taps, axis=1).reshape(N, 9 * C, H * W)


def residual_forward(x_nchw, params, eps=1e-5):
    """Residual(inp_dim, out_dim).forward, NCHW in / NCHW out."""
    N, Cin, H, W = x_nchw.shape
    mid = params["conv1_w"].shape[0]
    Cout = params["conv3_w"].shape[0]
    S = H * W

    # NCHW-native: flatten spatial onto the lane axis (free reshape, no transpose).
    x = x_nchw.reshape(N, Cin, S)

    s1, t1 = _bn_fold(params["bn1"], eps)
    s2, t2 = _bn_fold(params["bn2"], eps)
    s3, t3 = _bn_fold(params["bn3"], eps)

    # Skip branch: plain 1x1 conv (no BN / ReLU) when inp_dim != out_dim.
    if Cin != Cout:
        residual = _conv1x1(x, params["skip_w"][:, :, 0, 0], params["skip_b"])
    else:
        residual = x

    # conv1: fuse bn1+relu (prologue) and bn2+relu (epilogue) -> activated conv2 input.
    a2 = _conv1x1(x, params["conv1_w"][:, :, 0, 0], params["conv1_b"],
                  pre=(s1, t1), post=(s2, t2))

    # conv2 (3x3, padding=1): 9-tap im2col of the small half-width intermediate,
    # contracted over 9*mid channels by the same fused matmul kernel.
    a2_col = _im2col_3x3(a2, H, W)
    w2_col = params["conv2_w"].transpose(0, 2, 3, 1).reshape(mid, 9 * mid)
    y2 = _conv1x1(a2_col, w2_col, params["conv2_b"])

    # conv3: fuse bn3+relu (prologue) and the residual add (epilogue).
    out = _conv1x1(y2, params["conv3_w"][:, :, 0, 0], params["conv3_b"],
                   pre=(s3, t3), res=residual)

    return out.reshape(N, Cout, H, W)


# ---------------------------------------------------------------------------
# Pure-JAX reference (same inference semantics) and demo
# ---------------------------------------------------------------------------

def _conv_ref(a, w, b, pad):
    y = jax.lax.conv_general_dilated(
        a, w, window_strides=(1, 1), padding=((pad, pad), (pad, pad)),
        dimension_numbers=("NCHW", "OIHW", "NCHW"),
        precision=jax.lax.Precision.HIGHEST)
    return y + b[None, :, None, None]


def residual_reference(x, params, eps=1e-5):
    relu = lambda a: jnp.maximum(a, 0.0)

    def bn(a, p):
        scale = p["gamma"] / jnp.sqrt(p["var"] + eps)
        return ((a - p["mean"][None, :, None, None]) * scale[None, :, None, None]
                + p["beta"][None, :, None, None])

    Cin, Cout = x.shape[1], params["conv3_w"].shape[0]
    residual = _conv_ref(x, params["skip_w"], params["skip_b"], 0) if Cin != Cout else x
    out = relu(bn(x, params["bn1"]))
    out = _conv_ref(out, params["conv1_w"], params["conv1_b"], 0)
    out = relu(bn(out, params["bn2"]))
    out = _conv_ref(out, params["conv2_w"], params["conv2_b"], 1)
    out = relu(bn(out, params["bn3"]))
    out = _conv_ref(out, params["conv3_w"], params["conv3_b"], 0)
    return out + residual


if __name__ == "__main__":
    # Residual(inp_dim=4, out_dim=8) on a [2, 4, 16, 16] input (need_skip=True).
    N, inp_dim, out_dim, H, W = 2, 4, 8, 16, 16
    mid = out_dim // 2

    key = jax.random.PRNGKey(0)
    ks = jax.random.split(key, 12)
    rnd = lambda k, shape, s=0.1: jax.random.normal(k, shape, jnp.float32) * s

    x = jax.random.normal(ks[0], (N, inp_dim, H, W), jnp.float32)

    def bn_params(k, c):
        k1, k2, k3, k4 = jax.random.split(k, 4)
        return dict(gamma=1.0 + rnd(k1, (c,)), beta=rnd(k2, (c,)),
                    mean=rnd(k3, (c,)), var=1.0 + jnp.abs(rnd(k4, (c,))))

    params = dict(
        conv1_w=rnd(ks[1], (mid, inp_dim, 1, 1)),     conv1_b=rnd(ks[2], (mid,)),
        conv2_w=rnd(ks[3], (mid, mid, 3, 3)),         conv2_b=rnd(ks[4], (mid,)),
        conv3_w=rnd(ks[5], (out_dim, mid, 1, 1)),     conv3_b=rnd(ks[6], (out_dim,)),
        skip_w=rnd(ks[7], (out_dim, inp_dim, 1, 1)),  skip_b=rnd(ks[8], (out_dim,)),
        bn1=bn_params(ks[9], inp_dim),
        bn2=bn_params(ks[10], mid),
        bn3=bn_params(ks[11], mid),
    )

    out = jax.jit(residual_forward)(x, params)
    out = jax.block_until_ready(out)

    ref = residual_reference(x, params)
    assert out.shape == (N, out_dim, H, W), out.shape
    max_err = float(jnp.max(jnp.abs(out - ref)))
    assert jnp.allclose(out, ref, atol=1e-2, rtol=1e-2), f"mismatch vs reference, max abs err {max_err}"

    print("KERNEL_OK")
</pallas_src>

<mosaic_0001>
module attributes {stable_mosaic.version = 11 : i64} {
  func.func @kernel(%arg0: i32, %arg1: i32, %arg2: memref<1x4x128xf32, #tpu.memory_space<vmem>>, %arg3: memref<4x4xf32, #tpu.memory_space<vmem>>, %arg4: memref<4x1xf32, #tpu.memory_space<vmem>>, %arg5: memref<4x1xf32, #tpu.memory_space<vmem>>, %arg6: memref<4x1xf32, #tpu.memory_space<vmem>>, %arg7: memref<4x1xf32, #tpu.memory_space<vmem>>, %arg8: memref<4x1xf32, #tpu.memory_space<vmem>>, %arg9: memref<1x4x128xf32, #tpu.memory_space<vmem>>) attributes {dimension_semantics = [#tpu.dimension_semantics<parallel>, #tpu.dimension_semantics<parallel>], iteration_bounds = array<i64: 2, 2>, scalar_prefetch = 0 : i64, scratch_operands = 0 : i64, tpu.core_type = #tpu.core_type<tc>, window_params = [{transform_indices = @transform_0, window_bounds = array<i64: 1, 4, 128>}, {pipeline_mode = #tpu.pipeline_mode<synchronous>, transform_indices = @transform_1, window_bounds = array<i64: 4, 4>}, {pipeline_mode = #tpu.pipeline_mode<synchronous>, transform_indices = @transform_2, window_bounds = array<i64: 4, 1>}, {pipeline_mode = #tpu.pipeline_mode<synchronous>, transform_indices = @transform_3, window_bounds = array<i64: 4, 1>}, {pipeline_mode = #tpu.pipeline_mode<synchronous>, transform_indices = @transform_4, window_bounds = array<i64: 4, 1>}, {pipeline_mode = #tpu.pipeline_mode<synchronous>, transform_indices = @transform_5, window_bounds = array<i64: 4, 1>}, {pipeline_mode = #tpu.pipeline_mode<synchronous>, transform_indices = @transform_6, window_bounds = array<i64: 4, 1>}, {transform_indices = @transform_7, window_bounds = array<i64: 1, 4, 128>}]} {
    %c0 = arith.constant 0 : index
    %c0_0 = arith.constant 0 : index
    %c0_1 = arith.constant 0 : index
    %0 = vector.load %arg2[%c0, %c0_0, %c0_1] : memref<1x4x128xf32, #tpu.memory_space<vmem>>, vector<1x4x128xf32>
    %1 = vector.shape_cast %0 : vector<1x4x128xf32> to vector<4x128xf32>
    %c0_2 = arith.constant 0 : index
    %c0_3 = arith.constant 0 : index
    %2 = vector.load %arg5[%c0_2, %c0_3] : memref<4x1xf32, #tpu.memory_space<vmem>>, vector<4x1xf32>
    %3 = vector.broadcast %2 : vector<4x1xf32> to vector<4x128xf32>
    %4 = arith.mulf %1, %3 : vector<4x128xf32>
    %c0_4 = arith.constant 0 : index
    %c0_5 = arith.constant 0 : index
    %5 = vector.load %arg6[%c0_4, %c0_5] : memref<4x1xf32, #tpu.memory_space<vmem>>, vector<4x1xf32>
    %6 = vector.broadcast %5 : vector<4x1xf32> to vector<4x128xf32>
    %7 = arith.addf %4, %6 : vector<4x128xf32>
    %cst = arith.constant 0.000000e+00 : f32
    %8 = vector.broadcast %cst : f32 to vector<4x128xf32>
    %9 = arith.maximumf %7, %8 : vector<4x128xf32>
    %c0_6 = arith.constant 0 : index
    %c0_7 = arith.constant 0 : index
    %10 = vector.load %arg3[%c0_6, %c0_7] : memref<4x4xf32, #tpu.memory_space<vmem>>, vector<4x4xf32>
    %cst_8 = arith.constant dense<0.000000e+00> : vector<4x128xf32>
    %11 = tpu.matmul %10, %9, %cst_8 {dimension_numbers = #tpu.dot_dimension_numbers<[1], [0], [0], [1], [0, 0, 1, 1], [], []>} : vector<4x4xf32>, vector<4x128xf32>, vector<4x128xf32> -> vector<4x128xf32>
    %c0_9 = arith.constant 0 : index
    %c0_10 = arith.constant 0 : index
    %12 = vector.load %arg4[%c0_9, %c0_10] : memref<4x1xf32, #tpu.memory_space<vmem>>, vector<4x1xf32>
    %13 = vector.broadcast %12 : vector<4x1xf32> to vector<4x128xf32>
    %14 = arith.addf %11, %13 : vector<4x128xf32>
    %c0_11 = arith.constant 0 : index
    %c0_12 = arith.constant 0 : index
    %15 = vector.load %arg7[%c0_11, %c0_12] : memref<4x1xf32, #tpu.memory_space<vmem>>, vector<4x1xf32>
    %16 = vector.broadcast %15 : vector<4x1xf32> to vector<4x128xf32>
    %17 = arith.mulf %14, %16 : vector<4x128xf32>
    %c0_13 = arith.constant 0 : index
    %c0_14 = arith.constant 0 : index
    %18 = vector.load %arg8[%c0_13, %c0_14] : memref<4x1xf32, #tpu.memory_space<vmem>>, vector<4x1xf32>
    %19 = vector.broadcast %18 : vector<4x1xf32> to vector<4x128xf32>
    %20 = arith.addf %17, %19 : vector<4x128xf32>
    %cst_15 = arith.constant 0.000000e+00 : f32
    %21 = vector.broadcast %cst_15 : f32 to vector<4x128xf32>
    %22 = arith.maximumf %20, %21 : vector<4x128xf32>
    %c0_16 = arith.constant 0 : index
    %c0_17 = arith.constant 0 : index
    %c0_18 = arith.constant 0 : index
    %23 = vector.load %arg9[%c0_16, %c0_17, %c0_18] : memref<1x4x128xf32, #tpu.memory_space<vmem>>, vector<1x4x128xf32>
    %24 = vector.shape_cast %23 : vector<1x4x128xf32> to vector<4x128xf32>
    %25 = vector.shape_cast %22 : vector<4x128xf32> to vector<1x4x128xf32>
    tpu.vector_store %arg9[%c0_16, %c0_17, %c0_18], %25 {strides = array<i32>} : memref<1x4x128xf32, #tpu.memory_space<vmem>>, vector<1x4x128xf32>,
    return
  }
  func.func @transform_0(%arg0: i32, %arg1: i32) -> (i32, i32, i32) {
    %c0_i32 = arith.constant 0 : i32
    %c0_i32_0 = arith.constant 0 : i32
    return %arg0, %c0_i32, %arg1 : i32, i32, i32
  }
  func.func @transform_1(%arg0: i32, %arg1: i32) -> (i32, i32) {
    %c0_i32 = arith.constant 0 : i32
    %c0_i32_0 = arith.constant 0 : i32
    %c0_i32_1 = arith.constant 0 : i32
    return %c0_i32, %c0_i32_0 : i32, i32
  }
  func.func @transform_2(%arg0: i32, %arg1: i32) -> (i32, i32) {
    %c0_i32 = arith.constant 0 : i32
    %c0_i32_0 = arith.constant 0 : i32
    %c0_i32_1 = arith.constant 0 : i32
    return %c0_i32, %c0_i32_0 : i32, i32
  }
  func.func @transform_3(%arg0: i32, %arg1: i32) -> (i32, i32) {
    %c0_i32 = arith.constant 0 : i32
    %c0_i32_0 = arith.constant 0 : i32
    %c0_i32_1 = arith.constant 0 : i32
    return %c0_i32, %c0_i32_0 : i32, i32
  }
  func.func @transform_4(%arg0: i32, %arg1: i32) -> (i32, i32) {
    %c0_i32 = arith.constant 0 : i32
    %c0_i32_0 = arith.constant 0 : i32
    %c0_i32_1 = arith.constant 0 : i32
    return %c0_i32, %c0_i32_0 : i32, i32
  }
  func.func @transform_5(%arg0: i32, %arg1: i32) -> (i32, i32) {
    %c0_i32 = arith.constant 0 : i32
    %c0_i32_0 = arith.constant 0 : i32
    %c0_i32_1 = arith.constant 0 : i32
    return %c0_i32, %c0_i32_0 : i32, i32
  }
  func.func @transform_6(%arg0: i32, %arg1: i32) -> (i32, i32) {
    %c0_i32 = arith.constant 0 : i32
    %c0_i32_0 = arith.constant 0 : i32
    %c0_i32_1 = arith.constant 0 : i32
    return %c0_i32, %c0_i32_0 : i32, i32
  }
  func.func @transform_7(%arg0: i32, %arg1: i32) -> (i32, i32, i32) {
    %c0_i32 = arith.constant 0 : i32
    %c0_i32_0 = arith.constant 0 : i32
    return %arg0, %c0_i32, %arg1 : i32, i32, i32
  }
}

module attributes {stable_mosaic.version = 11 : i64} {
  func.func @kernel(%arg0: i32, %arg1: i32, %arg2: memref<1x36x128xf32, #tpu.memory_space<vmem>>, %arg3: memref<4x36xf32, #tpu.memory_space<vmem>>, %arg4: memref<4x1xf32, #tpu.memory_space<vmem>>, %arg5: memref<1x4x128xf32, #tpu.memory_space<vmem>>) attributes {dimension_semantics = [#tpu.dimension_semantics<parallel>, #tpu.dimension_semantics<parallel>], iteration_bounds = array<i64: 2, 2>, scalar_prefetch = 0 : i64, scratch_operands = 0 : i64, tpu.core_type = #tpu.core_type<tc>, window_params = [{transform_indices = @transform_0, window_bounds = array<i64: 1, 36, 128>}, {pipeline_mode = #tpu.pipeline_mode<synchronous>, transform_indices = @transform_1, window_bounds = array<i64: 4, 36>}, {pipeline_mode = #tpu.pipeline_mode<synchronous>, transform_indices = @transform_2, window_bounds = array<i64: 4, 1>}, {transform_indices = @transform_3, window_bounds = array<i64: 1, 4, 128>}]} {
    %c0 = arith.constant 0 : index
    %c0_0 = arith.constant 0 : index
    %c0_1 = arith.constant 0 : index
    %0 = vector.load %arg2[%c0, %c0_0, %c0_1] : memref<1x36x128xf32, #tpu.memory_space<vmem>>, vector<1x36x128xf32>
    %1 = vector.shape_cast %0 : vector<1x36x128xf32> to vector<36x128xf32>
    %c0_2 = arith.constant 0 : index
    %c0_3 = arith.constant 0 : index
    %2 = vector.load %arg3[%c0_2, %c0_3] : memref<4x36xf32, #tpu.memory_space<vmem>>, vector<4x36xf32>
    %cst = arith.constant dense<0.000000e+00> : vector<4x128xf32>
    %3 = tpu.matmul %2, %1, %cst {dimension_numbers = #tpu.dot_dimension_numbers<[1], [0], [0], [1], [0, 0, 1, 1], [], []>} : vector<4x36xf32>, vector<36x128xf32>, vector<4x128xf32> -> vector<4x128xf32>
    %c0_4 = arith.constant 0 : index
    %c0_5 = arith.constant 0 : index
    %4 = vector.load %arg4[%c0_4, %c0_5] : memref<4x1xf32, #tpu.memory_space<vmem>>, vector<4x1xf32>
    %5 = vector.broadcast %4 : vector<4x1xf32> to vector<4x128xf32>
    %6 = arith.addf %3, %5 : vector<4x128xf32>
    %c0_6 = arith.constant 0 : index
    %c0_7 = arith.constant 0 : index
    %c0_8 = arith.constant 0 : index
    %7 = vector.load %arg5[%c0_6, %c0_7, %c0_8] : memref<1x4x128xf32, #tpu.memory_space<vmem>>, vector<1x4x128xf32>
    %8 = vector.shape_cast %7 : vector<1x4x128xf32> to vector<4x128xf32>
    %9 = vector.shape_cast %6 : vector<4x128xf32> to vector<1x4x128xf32>
    tpu.vector_store %arg5[%c0_6, %c0_7, %c0_8], %9 {strides = array<i32>} : memref<1x4x128xf32, #tpu.memory_space<vmem>>, vector<1x4x128xf32>,
    return
  }
  func.func @transform_0(%arg0: i32, %arg1: i32) -> (i32, i32, i32) {
    %c0_i32 = arith.constant 0 : i32
    %c0_i32_0 = arith.constant 0 : i32
    return %arg0, %c0_i32, %arg1 : i32, i32, i32
  }
  func.func @transform_1(%arg0: i32, %arg1: i32) -> (i32, i32) {
    %c0_i32 = arith.constant 0 : i32
    %c0_i32_0 = arith.constant 0 : i32
    %c0_i32_1 = arith.constant 0 : i32
    return %c0_i32, %c0_i32_0 : i32, i32
  }
  func.func @transform_2(%arg0: i32, %arg1: i32) -> (i32, i32) {
    %c0_i32 = arith.constant 0 : i32
    %c0_i32_0 = arith.constant 0 : i32
    %c0_i32_1 = arith.constant 0 : i32
    return %c0_i32, %c0_i32_0 : i32, i32
  }
  func.func @transform_3(%arg0: i32, %arg1: i32) -> (i32, i32, i32) {
    %c0_i32 = arith.constant 0 : i32
    %c0_i32_0 = arith.constant 0 : i32
    return %arg0, %c0_i32, %arg1 : i32, i32, i32
  }
}

module attributes {stable_mosaic.version = 11 : i64} {
  func.func @kernel(%arg0: i32, %arg1: i32, %arg2: memref<1x4x128xf32, #tpu.memory_space<vmem>>, %arg3: memref<8x4xf32, #tpu.memory_space<vmem>>, %arg4: memref<8x1xf32, #tpu.memory_space<vmem>>, %arg5: memref<1x8x128xf32, #tpu.memory_space<vmem>>) attributes {dimension_semantics = [#tpu.dimension_semantics<parallel>, #tpu.dimension_semantics<parallel>], iteration_bounds = array<i64: 2, 2>, scalar_prefetch = 0 : i64, scratch_operands = 0 : i64, tpu.core_type = #tpu.core_type<tc>, window_params = [{transform_indices = @transform_0, window_bounds = array<i64: 1, 4, 128>}, {pipeline_mode = #tpu.pipeline_mode<synchronous>, transform_indices = @transform_1, window_bounds = array<i64: 8, 4>}, {pipeline_mode = #tpu.pipeline_mode<synchronous>, transform_indices = @transform_2, window_bounds = array<i64: 8, 1>}, {transform_indices = @transform_3, window_bounds = array<i64: 1, 8, 128>}]} {
    %c0 = arith.constant 0 : index
    %c0_0 = arith.constant 0 : index
    %c0_1 = arith.constant 0 : index
    %0 = vector.load %arg2[%c0, %c0_0, %c0_1] : memref<1x4x128xf32, #tpu.memory_space<vmem>>, vector<1x4x128xf32>
    %1 = vector.shape_cast %0 : vector<1x4x128xf32> to vector<4x128xf32>
    %c0_2 = arith.constant 0 : index
    %c0_3 = arith.constant 0 : index
    %2 = vector.load %arg3[%c0_2, %c0_3] : memref<8x4xf32, #tpu.memory_space<vmem>>, vector<8x4xf32>
    %cst = arith.constant dense<0.000000e+00> : vector<8x128xf32>
    %3 = tpu.matmul %2, %1, %cst {dimension_numbers = #tpu.dot_dimension_numbers<[1], [0], [0], [1], [0, 0, 1, 1], [], []>} : vector<8x4xf32>, vector<4x128xf32>, vector<8x128xf32> -> vector<8x128xf32>
    %c0_4 = arith.constant 0 : index
    %c0_5 = arith.constant 0 : index
    %4 = vector.load %arg4[%c0_4, %c0_5] : memref<8x1xf32, #tpu.memory_space<vmem>>, vector<8x1xf32>
    %5 = vector.broadcast %4 : vector<8x1xf32> to vector<8x128xf32>
    %6 = arith.addf %3, %5 : vector<8x128xf32>
    %c0_6 = arith.constant 0 : index
    %c0_7 = arith.constant 0 : index
    %c0_8 = arith.constant 0 : index
    %7 = vector.load %arg5[%c0_6, %c0_7, %c0_8] : memref<1x8x128xf32, #tpu.memory_space<vmem>>, vector<1x8x128xf32>
    %8 = vector.shape_cast %7 : vector<1x8x128xf32> to vector<8x128xf32>
    %9 = vector.shape_cast %6 : vector<8x128xf32> to vector<1x8x128xf32>
    tpu.vector_store %arg5[%c0_6, %c0_7, %c0_8], %9 {strides = array<i32>} : memref<1x8x128xf32, #tpu.memory_space<vmem>>, vector<1x8x128xf32>,
    return
  }
  func.func @transform_0(%arg0: i32, %arg1: i32) -> (i32, i32, i32) {
    %c0_i32 = arith.constant 0 : i32
    %c0_i32_0 = arith.constant 0 : i32
    return %arg0, %c0_i32, %arg1 : i32, i32, i32
  }
  func.func @transform_1(%arg0: i32, %arg1: i32) -> (i32, i32) {
    %c0_i32 = arith.constant 0 : i32
    %c0_i32_0 = arith.constant 0 : i32
    %c0_i32_1 = arith.constant 0 : i32
    return %c0_i32, %c0_i32_0 : i32, i32
  }
  func.func @transform_2(%arg0: i32, %arg1: i32) -> (i32, i32) {
    %c0_i32 = arith.constant 0 : i32
    %c0_i32_0 = arith.constant 0 : i32
    %c0_i32_1 = arith.constant 0 : i32
    return %c0_i32, %c0_i32_0 : i32, i32
  }
  func.func @transform_3(%arg0: i32, %arg1: i32) -> (i32, i32, i32) {
    %c0_i32 = arith.constant 0 : i32
    %c0_i32_0 = arith.constant 0 : i32
    return %arg0, %c0_i32, %arg1 : i32, i32, i32
  }
}

module attributes {stable_mosaic.version = 11 : i64} {
  func.func @kernel(%arg0: i32, %arg1: i32, %arg2: memref<1x4x128xf32, #tpu.memory_space<vmem>>, %arg3: memref<8x4xf32, #tpu.memory_space<vmem>>, %arg4: memref<8x1xf32, #tpu.memory_space<vmem>>, %arg5: memref<4x1xf32, #tpu.memory_space<vmem>>, %arg6: memref<4x1xf32, #tpu.memory_space<vmem>>, %arg7: memref<1x8x128xf32, #tpu.memory_space<vmem>>, %arg8: memref<1x8x128xf32, #tpu.memory_space<vmem>>) attributes {dimension_semantics = [#tpu.dimension_semantics<parallel>, #tpu.dimension_semantics<parallel>], iteration_bounds = array<i64: 2, 2>, scalar_prefetch = 0 : i64, scratch_operands = 0 : i64, tpu.core_type = #tpu.core_type<tc>, window_params = [{transform_indices = @transform_0, window_bounds = array<i64: 1, 4, 128>}, {pipeline_mode = #tpu.pipeline_mode<synchronous>, transform_indices = @transform_1, window_bounds = array<i64: 8, 4>}, {pipeline_mode = #tpu.pipeline_mode<synchronous>, transform_indices = @transform_2, window_bounds = array<i64: 8, 1>}, {pipeline_mode = #tpu.pipeline_mode<synchronous>, transform_indices = @transform_3, window_bounds = array<i64: 4, 1>}, {pipeline_mode = #tpu.pipeline_mode<synchronous>, transform_indices = @transform_4, window_bounds = array<i64: 4, 1>}, {transform_indices = @transform_5, window_bounds = array<i64: 1, 8, 128>}, {transform_indices = @transform_6, window_bounds = array<i64: 1, 8, 128>}]} {
    %c0 = arith.constant 0 : index
    %c0_0 = arith.constant 0 : index
    %c0_1 = arith.constant 0 : index
    %0 = vector.load %arg2[%c0, %c0_0, %c0_1] : memref<1x4x128xf32, #tpu.memory_space<vmem>>, vector<1x4x128xf32>
    %1 = vector.shape_cast %0 : vector<1x4x128xf32> to vector<4x128xf32>
    %c0_2 = arith.constant 0 : index
    %c0_3 = arith.constant 0 : index
    %2 = vector.load %arg5[%c0_2, %c0_3] : memref<4x1xf32, #tpu.memory_space<vmem>>, vector<4x1xf32>
    %3 = vector.broadcast %2 : vector<4x1xf32> to vector<4x128xf32>
    %4 = arith.mulf %1, %3 : vector<4x128xf32>
    %c0_4 = arith.constant 0 : index
    %c0_5 = arith.constant 0 : index
    %5 = vector.load %arg6[%c0_4, %c0_5] : memref<4x1xf32, #tpu.memory_space<vmem>>, vector<4x1xf32>
    %6 = vector.broadcast %5 : vector<4x1xf32> to vector<4x128xf32>
    %7 = arith.addf %4, %6 : vector<4x128xf32>
    %cst = arith.constant 0.000000e+00 : f32
    %8 = vector.broadcast %cst : f32 to vector<4x128xf32>
    %9 = arith.maximumf %7, %8 : vector<4x128xf32>
    %c0_6 = arith.constant 0 : index
    %c0_7 = arith.constant 0 : index
    %10 = vector.load %arg3[%c0_6, %c0_7] : memref<8x4xf32, #tpu.memory_space<vmem>>, vector<8x4xf32>
    %cst_8 = arith.constant dense<0.000000e+00> : vector<8x128xf32>
    %11 = tpu.matmul %10, %9, %cst_8 {dimension_numbers = #tpu.dot_dimension_numbers<[1], [0], [0], [1], [0, 0, 1, 1], [], []>} : vector<8x4xf32>, vector<4x128xf32>, vector<8x128xf32> -> vector<8x128xf32>
    %c0_9 = arith.constant 0 : index
    %c0_10 = arith.constant 0 : index
    %12 = vector.load %arg4[%c0_9, %c0_10] : memref<8x1xf32, #tpu.memory_space<vmem>>, vector<8x1xf32>
    %13 = vector.broadcast %12 : vector<8x1xf32> to vector<8x128xf32>
    %14 = arith.addf %11, %13 : vector<8x128xf32>
    %c0_11 = arith.constant 0 : index
    %c0_12 = arith.constant 0 : index
    %c0_13 = arith.constant 0 : index
    %15 = vector.load %arg7[%c0_11, %c0_12, %c0_13] : memref<1x8x128xf32, #tpu.memory_space<vmem>>, vector<1x8x128xf32>
    %16 = vector.shape_cast %15 : vector<1x8x128xf32> to vector<8x128xf32>
    %17 = arith.addf %14, %16 : vector<8x128xf32>
    %c0_14 = arith.constant 0 : index
    %c0_15 = arith.constant 0 : index
    %c0_16 = arith.constant 0 : index
    %18 = vector.load %arg8[%c0_14, %c0_15, %c0_16] : memref<1x8x128xf32, #tpu.memory_space<vmem>>, vector<1x8x128xf32>
    %19 = vector.shape_cast %18 : vector<1x8x128xf32> to vector<8x128xf32>
    %20 = vector.shape_cast %17 : vector<8x128xf32> to vector<1x8x128xf32>
    tpu.vector_store %arg8[%c0_14, %c0_15, %c0_16], %20 {strides = array<i32>} : memref<1x8x128xf32, #tpu.memory_space<vmem>>, vector<1x8x128xf32>,
    return
  }
  func.func @transform_0(%arg0: i32, %arg1: i32) -> (i32, i32, i32) {
    %c0_i32 = arith.constant 0 : i32
    %c0_i32_0 = arith.constant 0 : i32
    return %arg0, %c0_i32, %arg1 : i32, i32, i32
  }
  func.func @transform_1(%arg0: i32, %arg1: i32) -> (i32, i32) {
    %c0_i32 = arith.constant 0 : i32
    %c0_i32_0 = arith.constant 0 : i32
    %c0_i32_1 = arith.constant 0 : i32
    return %c0_i32, %c0_i32_0 : i32, i32
  }
  func.func @transform_2(%arg0: i32, %arg1: i32) -> (i32, i32) {
    %c0_i32 = arith.constant 0 : i32
    %c0_i32_0 = arith.constant 0 : i32
    %c0_i32_1 = arith.constant 0 : i32
    return %c0_i32, %c0_i32_0 : i32, i32
  }
  func.func @transform_3(%arg0: i32, %arg1: i32) -> (i32, i32) {
    %c0_i32 = arith.constant 0 : i32
    %c0_i32_0 = arith.constant 0 : i32
    %c0_i32_1 = arith.constant 0 : i32
    return %c0_i32, %c0_i32_0 : i32, i32
  }
  func.func @transform_4(%arg0: i32, %arg1: i32) -> (i32, i32) {
    %c0_i32 = arith.constant 0 : i32
    %c0_i32_0 = arith.constant 0 : i32
    %c0_i32_1 = arith.constant 0 : i32
    return %c0_i32, %c0_i32_0 : i32, i32
  }
  func.func @transform_5(%arg0: i32, %arg1: i32) -> (i32, i32, i32) {
    %c0_i32 = arith.constant 0 : i32
    %c0_i32_0 = arith.constant 0 : i32
    return %arg0, %c0_i32, %arg1 : i32, i32, i32
  }
  func.func @transform_6(%arg0: i32, %arg1: i32) -> (i32, i32, i32) {
    %c0_i32 = arith.constant 0 : i32
    %c0_i32_0 = arith.constant 0 : i32
    return %arg0, %c0_i32, %arg1 : i32, i32, i32
  }
}

</mosaic_0001>

<bundles_post_ra>
// kernel: residual_forward.5
= control target key start
LH: loop header
LB: loop body
LE: loop exit
PB: predicated region body
PF: predicated region fallthrough
CT: control target
= control target key end

     0   :  { %s661_s24 = smov 0   ;;  %s663_s25 = smov 0   ;;  %s738_s0 = inlined_call_operand.vmem [shape: f32[2,4,256], index: 0, kind: input, shape index: {}]   ;;  %s739_s1 = inlined_call_operand.vmem [shape: f32[4,4], index: 1, kind: input, shape index: {}]   ;;  %s740_s2 = inlined_call_operand.vmem [shape: f32[4,1], index: 2, kind: input, shape index: {}]   ;;  %s741_s3 = inlined_call_operand.vmem [shape: f32[4,1], index: 3, kind: input, shape index: {}]   ;;  %s742_s4 = inlined_call_operand.vmem [shape: f32[4,1], index: 4, kind: input, shape index: {}]   ;;  %s743_s5 = inlined_call_operand.vmem [shape: f32[4,1], index: 5, kind: input, shape index: {}]   ;;  %s744_s6 = inlined_call_operand.vmem [shape: f32[4,1], index: 6, kind: input, shape index: {}]   ;;  %s745_s7 = inlined_call_operand.vmem [shape: f32[2,4,256], index: 7, kind: output, shape index: {}]  }
   0x1   :  { %s665_s26 = smov 0   ;;  %s667_s27 = smov 0  }
   0x2   :  { %s669_s28 = smov 0  }
   0x3 LB: > { %s26_s29 = sadd.s32 1, %s608_s26  ;;  %s29_s30 = sadd.s32 1, %s612_s27  ;;  %s616_s28 = sphi %s669_s28, %s17_s28   ;;  %s612_s27 = sphi %s667_s27, %s749_s27   ;;  %s608_s26 = sphi %s665_s26, %s748_s26   ;;  %s604_s25 = sphi %s663_s25, %s747_s25   ;;  %s600_s24 = sphi %s661_s24, %s746_s24  }
   0x4   : > { %p27_p0 = scmp.ge.s32.totalorder %s26_s29, 2  ;;  %p517_p1 = scmp.ge.s32.totalorder %s616_s28, 1 }
   0x5   : > { %p256_p2 = scmp.lt.s32.totalorder %s616_s28, 5 }
   0x6   : > { %s751_s29 = smov (%p27_p0, %s26_s29), 0  ;;  %s753_s30 = smov (!%p27_p0, %s29_s30), %s612_s27 }
   0x7   : > { %p257_p3 = pnand %p517_p1, %p256_p2  ;;  %p31_p4 = scmp.ge.s32.totalorder %s753_s30, 2 }
   0x8   : > { %v311_v0 = vld [vmem:[%s741_s3] sm:$0xf] (!%p257_p3)  ;;  %v618_v1 = vmov (!%p257_p3), 0   ;;  %v619_v4 = vmov (!%p257_p3), 0.0   ;;  %vm620_vm0 = vmmov (!%p257_p3), 0   ;;  %p294_p5 = scmp.lt.s32.totalorder (!%p257_p3), %s604_s25, 1 }
   0x9   : > { %s755_s30 = smov (%p31_p4, %s753_s30), 0  ;;  %260 = sbr.rel (%p257_p3) target bundleno = 369 (0x171), region = 48 }
   0xa   : > { %576 = vset.pattern.permute.xlu0 (!%p257_p3), %v618_v1  ;;  %577 = vset.pattern.permute.xlu1 (!%p257_p3), %v618_v1  ;;  %v318_v2 = vld [vmem:[%s742_s4] sm:$0xf] (!%p257_p3)  ;;  %p296_p6 = scmp.lt.s32.totalorder (!%p257_p3), %s600_s24, 1  ;;  %vm337_vm1 = vcmask (!%p257_p3), 1043456   ;;  %vm333_vm2 = vcmask (!%p257_p3), 31744  }
   0xb   : > { %314 = vperm.xlu0 (!%p257_p3), %576, %v311_v0   ;;  %v418_v3 = vld [vmem:[%s744_s6] sm:$0xf] (!%p257_p3)  ;;  %528 = vmatprep.subr.mxu0 (!%p257_p3), %v619_v4 }
   0xc   : > { %530 = vmatprep.mubr.msk.f32.mxu0 (!%p257_p3), %vm620_vm0, %v619_v4  ;;  %v327_v5 = vld [vmem:[%s740_s2] sm:$0xf] (!%p257_p3) }
   0xd   : > { %330 = vperm.xlu1 (!%p257_p3), %577, %v327_v5   ;;  %v411_v6 = vld [vmem:[%s743_s5] sm:$0xf] (!%p257_p3) }
   0xe   : > { %v326_v13 = vld [vmem:[%s739_s1] sm:$0xf] (!%p257_p3) }
   0xf   : > { %321 = vperm.xlu0 (!%p257_p3), %576, %v318_v2  }
  0x10   : > { %s757_s25 = smov (!%p294_p5, %s604_s25), 1  ;;  %s759_s24 = smov (!%p296_p6, %s600_s24), 1 }
  0x11   : > { %414 = vperm.xlu1 %577, %v411_v6   ;;  %s518_s18 = sshll.u32 %s757_s25, 1 }
  0x12   : > { %s299_s19 = sadd.s32 %s518_s18, %s759_s24 }
  0x13   : > { %421 = vperm.xlu0 %576, %v418_v3   ;;  %s519_s20 = sshll.u32 %s299_s19, 2 }
  0x14   : > { %s301_s23 = scalar_lea.vmem %s738_s0, %s519_s20  ;;  %s309_s10 = scalar_lea.vmem %s745_s7, %s519_s20 }
  0x15   : > { %v310_v8 = vld [vmem:[%s301_s23] sm:$0xf] }
  0x8a   : > { %v315_v7 = vpop.permute.xlu0 %314 }
  0x8b   : > { %v317_v9 = vmul.f32 %v315_v7, %v310_v8 }
  0x8c   : > { %v331_v14 = vpop.permute.xlu1 %330 }
  0x8e   : > { %v322_v10 = vpop.permute.xlu0 %321 }
  0x8f   : > { %v324_v11 = vadd.f32 %v322_v10, %v317_v9 }
  0x90   : > { %v415_v18 = vpop.permute.xlu1 %414 }
  0x91   : > { %v325_v12 = vmax.f32 %v324_v11, 0.0 }
  0x92   : > { %v422_v20 = vpop.permute.xlu0 %421 }
  0x93   : > { %529 = vmatpush3.msk.msra.mxu0 %vm337_vm1, %v325_v12 }
  0x94   : > { %531 = vmatmul.mubr.msk.f32.vlgmr.msra.gmra.mrb[0].mxu0 %vm333_vm2, %v326_v13 }
 0x167   : > { %v407_v15 = vpop.f32.mrb[0].mxu0 }
 0x168   : > { %v408_v16 = vadd.f32 %v407_v15, %v331_v14  ;;  %v532_v17 = vpop.f32.mrb[1].mxu0 }
 0x16a   : > { %v417_v19 = vmul.f32 %v415_v18, %v408_v16 }
 0x16c   : > { %v424_v21 = vadd.f32 %v422_v20, %v417_v19 }
 0x16e   : > { %v425_v22 = vmax.f32 %v424_v21, 0.0 }
 0x170   : > { %426 = vst [vmem:[%s309_s10] sm:$0xf] %v425_v22 }
 0x171 PF: > { %s17_s28 = sadd.s32 1, %s616_s28   ;;  %s746_s24 = smov %s608_s26 }
 0x172   : > { %p14_p7 = scmp.ge.s32.totalorder %s17_s28, 6   ;;  %s747_s25 = smov %s612_s27 }
 0x173   : > { %s748_s26 = smov %s751_s29  ;;  %s749_s27 = smov %s755_s30 }
 0x174   :  { %16 = sbr.rel (!%p14_p7) target bundleno = 3 (0x3), region = 78 }

// kernel: residual_forward.4
= control target key start
LH: loop header
LB: loop body
LE: loop exit
PB: predicated region body
PF: predicated region fallthrough
CT: control target
= control target key end

     0   :  { %s502_s12 = smov 0   ;;  %s504_s13 = smov 0   ;;  %s559_s0 = inlined_call_operand.vmem [shape: f32[2,4,256], index: 0, kind: input, shape index: {}]   ;;  %s560_s1 = inlined_call_operand.vmem [shape: f32[8,4], index: 1, kind: input, shape index: {}]   ;;  %s561_s2 = inlined_call_operand.vmem [shape: f32[8,1], index: 2, kind: input, shape index: {}]   ;;  %s562_s3 = inlined_call_operand.vmem [shape: f32[2,8,256], index: 3, kind: output, shape index: {}]  }
   0x1   :  { %s506_s14 = smov 0   ;;  %s508_s15 = smov 0  }
   0x2   :  { %s510_s16 = smov 0  }
   0x3 LB: > { %s22_s17 = sadd.s32 1, %s469_s14  ;;  %s25_s18 = sadd.s32 1, %s473_s15  ;;  %s477_s16 = sphi %s510_s16, %s13_s16   ;;  %s473_s15 = sphi %s508_s15, %s566_s15   ;;  %s469_s14 = sphi %s506_s14, %s565_s14   ;;  %s465_s13 = sphi %s504_s13, %s564_s13   ;;  %s461_s12 = sphi %s502_s12, %s563_s12  }
   0x4   : > { %p23_p0 = scmp.ge.s32.totalorder %s22_s17, 2  ;;  %p379_p1 = scmp.ge.s32.totalorder %s477_s16, 1 }
   0x5   : > { %p156_p2 = scmp.lt.s32.totalorder %s477_s16, 5 }
   0x6   : > { %s568_s17 = smov (%p23_p0, %s22_s17), 0  ;;  %s570_s18 = smov (!%p23_p0, %s25_s18), %s473_s15 }
   0x7   : > { %p157_p3 = pnand %p379_p1, %p156_p2  ;;  %p27_p4 = scmp.ge.s32.totalorder %s570_s18, 2 }
   0x8   : > { %p186_p5 = scmp.lt.s32.totalorder (!%p157_p3), %s465_s13, 1  ;;  %p188_p6 = scmp.lt.s32.totalorder (!%p157_p3), %s461_s12, 1  ;;  %v479_v0 = vmov (!%p157_p3), 0.0   ;;  %vm480_vm0 = vmmov (!%p157_p3), 0   ;;  %v204_v1 = vld [vmem:[%s561_s2] sm:$0xff] (!%p157_p3)  ;;  %v481_v2 = vmov (!%p157_p3), 0  }
   0x9   : > { %s572_s18 = smov (%p27_p4, %s570_s18), 0  ;;  %160 = sbr.rel (%p157_p3) target bundleno = 238 (0xee), region = 32 }
   0xa   : > { %390 = vmatprep.subr.mxu0 (!%p157_p3), %v479_v0  ;;  %392 = vmatprep.mubr.msk.f32.mxu0 (!%p157_p3), %vm480_vm0, %v479_v0  ;;  %vm214_vm1 = vcmask (!%p157_p3), 1043456   ;;  %v203_v3 = vld [vmem:[%s560_s1] sm:$0xff] (!%p157_p3)  ;;  %vm210_vm2 = vcmask (!%p157_p3), 31744  }
   0xb   : > { %438 = vset.pattern.permute.xlu0 (!%p157_p3), %v481_v2 }
   0xc   : > { %207 = vperm.xlu0 (!%p157_p3), %438, %v204_v1  }
  0x10   : > { %s574_s13 = smov (!%p186_p5, %s465_s13), 1  ;;  %s576_s12 = smov (!%p188_p6, %s461_s12), 1 }
  0x11   : > { %s380_s21 = sshll.u32 %s574_s13, 1 }
  0x12   : > { %s191_s22 = sadd.s32 %s380_s21, %s576_s12 }
  0x13   : > { %s381_s23 = sshll.u32 %s191_s22, 2  ;;  %s383_s29 = sshll.u32 %s191_s22, 3 }
  0x14   : > { %s193_s26 = scalar_lea.vmem %s559_s0, %s381_s23  ;;  %s201_s5 = scalar_lea.vmem %s562_s3, %s383_s29 }
  0x15   : > { %v202_v4 = vld [vmem:[%s193_s26] sm:$0xf] }
  0x16   : > { %391 = vmatpush3.msk.msra.mxu0 %vm214_vm1, %v202_v4 }
  0x17   : > { %393 = vmatmul.mubr.msk.f32.vlgmr.msra.gmra.mrb[0].mxu0 %vm210_vm2, %v203_v3 }
  0x8b   : > { %v208_v5 = vpop.permute.xlu0 %207 }
  0xea   : > { %v284_v6 = vpop.f32.mrb[0].mxu0 }
  0xeb   : > { %v285_v7 = vadd.f32 %v284_v6, %v208_v5  ;;  %v394_v8 = vpop.f32.mrb[1].mxu0 }
  0xed   : > { %288 = vst [vmem:[%s201_s5] sm:$0xff] %v285_v7 }
  0xee PF: > { %s13_s16 = sadd.s32 1, %s477_s16   ;;  %s563_s12 = smov %s469_s14 }
  0xef   : > { %p10_p7 = scmp.ge.s32.totalorder %s13_s16, 6   ;;  %s564_s13 = smov %s473_s15 }
  0xf0   : > { %s565_s14 = smov %s568_s17  ;;  %s566_s15 = smov %s572_s18 }
  0xf1   :  { %12 = sbr.rel (!%p10_p7) target bundleno = 3 (0x3), region = 62 }

// kernel: residual_forward.6
= control target key start
LH: loop header
LB: loop body
LE: loop exit
PB: predicated region body
PF: predicated region fallthrough
CT: control target
= control target key end

     0   :  { %s605_s12 = smov 0   ;;  %s607_s13 = smov 0   ;;  %s702_s0 = inlined_call_operand.vmem [shape: f32[2,36,256], index: 0, kind: input, shape index: {}]   ;;  %s703_s1 = inlined_call_operand.vmem [shape: f32[4,36], index: 1, kind: input, shape index: {}]   ;;  %s704_s2 = inlined_call_operand.vmem [shape: f32[4,1], index: 2, kind: input, shape index: {}]   ;;  %s705_s3 = inlined_call_operand.vmem [shape: f32[2,4,256], index: 3, kind: output, shape index: {}]  }
   0x1   :  { %s609_s14 = smov 0   ;;  %s611_s15 = smov 0  }
   0x2   :  { %s613_s16 = smov 0   ;;  %s615_s17 = smov 0  }
   0x3   :  { %s617_s18 = smov 0  }
   0x4 LB: > { %s22_s19 = sadd.s32 1, %s571_s16  ;;  %s25_s20 = sadd.s32 1, %s575_s17  ;;  %s579_s18 = sphi %s617_s18, %s13_s18   ;;  %s575_s17 = sphi %s615_s17, %s711_s17   ;;  %s571_s16 = sphi %s613_s16, %s710_s16   ;;  %s567_s15 = sphi %s611_s15, %s709_s15   ;;  %s563_s14 = sphi %s609_s14, %s708_s14   ;;  %s559_s13 = sphi %s607_s13, %s707_s13   ;;  %s555_s12 = sphi %s605_s12, %s706_s12  }
   0x5   : > { %p23_p0 = scmp.ge.s32.totalorder %s22_s19, 2  ;;  %p41_p1 = scmp.ne.s32.totalorder %s559_s13, %s555_s12 }
   0x6   : > { %p42_p2 = scmp.eq.s32.totalorder %s579_s18, 0  ;;  %s34_s24 = sadd.s32 1, %s559_s13 }
   0x7   : > { %s713_s19 = smov (%p23_p0, %s22_s19), 0  ;;  %s715_s20 = smov (!%p23_p0, %s25_s20), %s575_s17 }
   0x8   : > { %p43_p3 = por %p42_p2, %p41_p1  ;;  %p27_p4 = scmp.ge.s32.totalorder %s715_s20, 2 }
   0x9   : > { %s30_s21 = ssub.s32 %s571_s16, %s713_s19  ;;  %p427_p6 = scmp.ge.s32.totalorder %s579_s18, 4 }
   0xa   : > { %s717_s20 = smov (%p27_p4, %s715_s20), 0 }
   0xb   : > { %s29_s22 = ssub.s32 %s575_s17, %s717_s20  ;;  %143 = sbr.rel (%p427_p6) target bundleno = 28 (0x1c), region = 24 }
   0xc   : > { %s31_s23 = sor.u32 %s30_s21, %s29_s22 }
   0xd   : > { %p32_p5 = scmp.eq.s32.totalorder %s31_s23, 0 }
   0xf   : > { %s656_s25 = scalar_select %p32_p5, %s559_s13, %s34_s24  }
  0x12   : > { %146 = sbr.rel (!%p43_p3) target bundleno = 28 (0x1c), region = 28  ;;  %s148_s26 = sand.u32 (%p43_p3), 1, %s559_s13  }
  0x13   : > { %s462_s27 = smul.u32 (%p43_p3), 10, %s575_s17 }
  0x14   : > { %s461_s28 = smul.u32 (%p43_p3), 40, %s148_s26 }
  0x15   : > { %s152_s29 = sadd.s32 (%p43_p3), %s571_s16, %s462_s27 }
  0x16   : > { %s428_s30 = sshll.u32 (%p43_p3), %s152_s29, 3  ;;  %s150_s7 = scalar_lea.vmem (%p43_p3), [#allocation2], %s461_s28 }
  0x17   : > { %s154_s6 = scalar_lea.vmem (%p43_p3), %s702_s0, %s428_s30 }
  0x18   : > { %v190_v0 = vld [vmem:[%s154_s6] sm:$0xff] (%p43_p3)  ;;  %v192_v1 = vld [vmem:[%s154_s6 + $0x10] sm:$0xff] (%p43_p3) }
  0x19   : > { %v194_v2 = vld [vmem:[%s154_s6 + $0x20] sm:$0xff]  ;;  %191 = vst [vmem:[%s150_s7] sm:$0xff] %v190_v0  ;;  %193 = vst [vmem:[%s150_s7 + $0x8] sm:$0xff] %v192_v1  ;;  %v196_v3 = vld [vmem:[%s154_s6 + $0x30] sm:$0xff] }
  0x1a   : > { %195 = vst [vmem:[%s150_s7 + $0x10] sm:$0xff] %v194_v2  ;;  %v198_v4 = vld [vmem:[%s154_s6 + $0x40] sm:$0xff]  ;;  %197 = vst [vmem:[%s150_s7 + $0x18] sm:$0xff] %v196_v3 }
  0x1b   : > { %199 = vst [vmem:[%s150_s7 + $0x20] sm:$0xff] %v198_v4 }
  0x1c PF: > { %p429_p7 = scmp.ge.s32.totalorder %s579_s18, 1  ;;  %p204_p8 = scmp.lt.s32.totalorder %s579_s18, 5 }
  0x1e   : > { %p205_p9 = pnand %p429_p7, %p204_p8 }
  0x1f   : > { %s211_s8 = sand.u32 (!%p205_p9), 1, %s555_s12   ;;  %v581_v5 = vmov (!%p205_p9), 0.0|0.0   ;;  %vm582_vm0 = vmmov (!%p205_p9), 0   ;;  %v583_v6 = vmov (!%p205_p9), 0.0   ;;  %v584_v7 = vmov (!%p205_p9), 0   ;;  %p237_p10 = scmp.lt.s32.totalorder (!%p205_p9), %s567_s15, 1 }
  0x20   : > { %208 = sbr.rel (%p205_p9) target bundleno = 263 (0x107), region = 66  ;;  %455 = vmatprep.subr.bf16.mxu0 (!%p205_p9), %v581_v5  ;;  %452 = vmatprep.mubr.msk.f32.mxu0 (!%p205_p9), %vm582_vm0, %v583_v6  ;;  %v251_v8 = vld [vmem:[%s704_s2] sm:$0xf] (!%p205_p9)  ;;  %vm261_vm1 = vcmask (!%p205_p9), 1043456   ;;  %vm257_vm2 = vcmask (!%p205_p9), 293888   ;;  %p239_p11 = scmp.lt.s32.totalorder (!%p205_p9), %s563_s14, 1 }
  0x21   : > { %s463_s9 = smul.u32 (!%p205_p9), 40, %s211_s8  ;;  %524 = vset.pattern.permute.xlu0 (!%p205_p9), %v584_v7  ;;  %v250_v16 = vld [vmem:[%s703_s1] sm:$0xf] (!%p205_p9) }
  0x22   : > { %254 = vperm.xlu0 (!%p205_p9), %524, %v251_v8  }
  0x23   : > { %s213_s21 = scalar_lea.vmem (!%p205_p9), [#allocation2], %s463_s9 }
  0x24   : > { %v245_v9 = vld [vmem:[%s213_s21] sm:$0xff] (!%p205_p9)  ;;  %v246_v10 = vld [vmem:[%s213_s21 + $0x8] sm:$0xff] (!%p205_p9)  ;;  %v247_v11 = vld [vmem:[%s213_s21 + $0x10] sm:$0xff] (!%p205_p9) }
  0x25   : > { %v456_v12 = vpack.c.bf16 (!%p205_p9), %v246_v10, %v245_v9  ;;  %v248_v13 = vld [vmem:[%s213_s21 + $0x18] sm:$0xff] (!%p205_p9)  ;;  %v249_v15 = vld [vmem:[%s213_s21 + $0x20] sm:$0xf] (!%p205_p9) }
  0x26   : > { %v459_v14 = vpack.c.bf16 (!%p205_p9), %v248_v13, %v247_v11 }
  0x27   : > { %457 = vmatpush3.bf16.msra.mxu0 %v456_v12  ;;  %s719_s15 = smov (!%p237_p10, %s567_s15), 1  ;;  %s721_s14 = smov (!%p239_p11, %s563_s14), 1 }
  0x28   : > { %458 = vmatprep.subr.bf16.mxu0 %v581_v5  ;;  %s430_s23 = sshll.u32 %s719_s15, 1 }
  0x29   : > { %s242_s24 = sadd.s32 %s430_s23, %s721_s14 }
  0x2a   : > { %s431_s26 = sshll.u32 %s242_s24, 2 }
  0x2b   : > { %460 = vmatpush3.bf16.msra.mxu0 %v459_v14  ;;  %s244_s29 = scalar_lea.vmem %s705_s3, %s431_s26 }
  0x2c   : > { %450 = vmatprep.subr.mxu0 %v583_v6 }
  0x2f   : > { %451 = vmatpush3.msk.msra.mxu0 %vm261_vm1, %v249_v15 }
  0x30   : > { %453 = vmatmul.mubr.msk.f32.vlgmr.msra.gmra.mrb[0].mxu0 %vm257_vm2, %v250_v16 }
  0xa1   : > { %v255_v17 = vpop.permute.xlu0 %254 }
 0x103   : > { %v331_v18 = vpop.f32.mrb[0].mxu0 }
 0x104   : > { %v332_v19 = vadd.f32 %v331_v18, %v255_v17  ;;  %v454_v20 = vpop.f32.mrb[1].mxu0 }
 0x106   : > { %335 = vst [vmem:[%s244_s29] sm:$0xf] %v332_v19 }
 0x107 PF: > { %s13_s18 = sadd.s32 1, %s579_s18   ;;  %s706_s12 = smov %s559_s13 }
 0x108   : > { %p10_p12 = scmp.ge.s32.totalorder %s13_s18, 6   ;;  %s707_s13 = smov %s656_s25 }
 0x109   : > { %s708_s14 = smov %s571_s16  ;;  %s709_s15 = smov %s575_s17 }
 0x10a   : > { %s710_s16 = smov %s713_s19  ;;  %s711_s17 = smov %s717_s20 }
 0x10b   :  { %12 = sbr.rel (!%p10_p12) target bundleno = 4 (0x4), region = 105 }

// kernel: residual_forward.7
= control target key start
LH: loop header
LB: loop body
LE: loop exit
PB: predicated region body
PF: predicated region fallthrough
CT: control target
= control target key end

     0   :  { %s667_s21 = smov 0   ;;  %s669_s22 = smov 0   ;;  %s741_s0 = inlined_call_operand.vmem [shape: f32[2,4,256], index: 0, kind: input, shape index: {}]   ;;  %s742_s1 = inlined_call_operand.vmem [shape: f32[8,4], index: 1, kind: input, shape index: {}]   ;;  %s743_s2 = inlined_call_operand.vmem [shape: f32[8,1], index: 2, kind: input, shape index: {}]   ;;  %s744_s3 = inlined_call_operand.vmem [shape: f32[4,1], index: 3, kind: input, shape index: {}]   ;;  %s745_s4 = inlined_call_operand.vmem [shape: f32[4,1], index: 4, kind: input, shape index: {}]   ;;  %s746_s5 = inlined_call_operand.vmem [shape: f32[2,8,256], index: 5, kind: input, shape index: {}]   ;;  %s747_s6 = inlined_call_operand.vmem [shape: f32[2,8,256], index: 6, kind: output, shape index: {}]  }
   0x1   :  { %s671_s23 = smov 0   ;;  %s673_s24 = smov 0  }
   0x2   :  { %s675_s25 = smov 0  }
   0x3 LB: > { %s25_s26 = sadd.s32 1, %s619_s23  ;;  %s28_s27 = sadd.s32 1, %s623_s24  ;;  %s627_s25 = sphi %s675_s25, %s16_s25   ;;  %s623_s24 = sphi %s673_s24, %s751_s24   ;;  %s619_s23 = sphi %s671_s23, %s750_s23   ;;  %s615_s22 = sphi %s669_s22, %s749_s22   ;;  %s611_s21 = sphi %s667_s21, %s748_s21  }
   0x4   : > { %p26_p0 = scmp.ge.s32.totalorder %s25_s26, 2  ;;  %p526_p1 = scmp.ge.s32.totalorder %s627_s25, 1 }
   0x5   : > { %p246_p2 = scmp.lt.s32.totalorder %s627_s25, 5 }
   0x6   : > { %s753_s26 = smov (%p26_p0, %s25_s26), 0  ;;  %s755_s27 = smov (!%p26_p0, %s28_s27), %s623_s24 }
   0x7   : > { %p247_p3 = pnand %p526_p1, %p246_p2  ;;  %p30_p4 = scmp.ge.s32.totalorder %s755_s27, 2 }
   0x8   : > { %v315_v0 = vld [vmem:[%s744_s3] sm:$0xf] (!%p247_p3)  ;;  %v629_v1 = vmov (!%p247_p3), 0   ;;  %v630_v3 = vmov (!%p247_p3), 0.0   ;;  %vm631_vm0 = vmmov (!%p247_p3), 0   ;;  %p290_p5 = scmp.lt.s32.totalorder (!%p247_p3), %s615_s22, 1 }
   0x9   : > { %s757_s27 = smov (%p30_p4, %s755_s27), 0  ;;  %250 = sbr.rel (%p247_p3) target bundleno = 365 (0x16d), region = 44 }
   0xa   : > { %587 = vset.pattern.permute.xlu0 (!%p247_p3), %v629_v1  ;;  %588 = vset.pattern.permute.xlu1 (!%p247_p3), %v629_v1  ;;  %v322_v2 = vld [vmem:[%s745_s4] sm:$0xf] (!%p247_p3)  ;;  %p292_p6 = scmp.lt.s32.totalorder (!%p247_p3), %s611_s21, 1  ;;  %vm341_vm1 = vcmask (!%p247_p3), 1043456   ;;  %vm337_vm2 = vcmask (!%p247_p3), 31744  }
   0xb   : > { %318 = vperm.xlu0 (!%p247_p3), %587, %v315_v0   ;;  %539 = vmatprep.subr.mxu0 (!%p247_p3), %v630_v3  ;;  %v331_v4 = vld [vmem:[%s743_s2] sm:$0xff] (!%p247_p3) }
   0xc   : > { %541 = vmatprep.mubr.msk.f32.mxu0 (!%p247_p3), %vm631_vm0, %v630_v3  ;;  %334 = vperm.xlu1 (!%p247_p3), %588, %v331_v4   ;;  %v330_v11 = vld [vmem:[%s742_s1] sm:$0xff] (!%p247_p3) }
   0xf   : > { %325 = vperm.xlu0 (!%p247_p3), %587, %v322_v2  }
  0x10   : > { %s759_s22 = smov (!%p290_p5, %s615_s22), 1  ;;  %s761_s21 = smov (!%p292_p6, %s611_s21), 1 }
  0x11   : > { %s527_s10 = sshll.u32 %s759_s22, 1 }
  0x12   : > { %s295_s11 = sadd.s32 %s527_s10, %s761_s21 }
  0x13   : > { %s528_s12 = sshll.u32 %s295_s11, 2  ;;  %s530_s18 = sshll.u32 %s295_s11, 3 }
  0x14   : > { %s297_s15 = scalar_lea.vmem %s741_s0, %s528_s12  ;;  %s305_s21 = scalar_lea.vmem %s746_s5, %s530_s18 }
  0x15   : > { %v314_v6 = vld [vmem:[%s297_s15] sm:$0xf]  ;;  %s313_s29 = scalar_lea.vmem %s747_s6, %s530_s18 }
  0x16   : > { %v415_v14 = vld [vmem:[%s305_s21] sm:$0xff] }
  0x8a   : > { %v319_v5 = vpop.permute.xlu0 %318 }
  0x8b   : > { %v321_v7 = vmul.f32 %v319_v5, %v314_v6  ;;  %v335_v12 = vpop.permute.xlu1 %334 }
  0x8e   : > { %v326_v8 = vpop.permute.xlu0 %325 }
  0x8f   : > { %v328_v9 = vadd.f32 %v326_v8, %v321_v7 }
  0x91   : > { %v329_v10 = vmax.f32 %v328_v9, 0.0 }
  0x93   : > { %540 = vmatpush3.msk.msra.mxu0 %vm341_vm1, %v329_v10 }
  0x94   : > { %542 = vmatmul.mubr.msk.f32.vlgmr.msra.gmra.mrb[0].mxu0 %vm337_vm2, %v330_v11 }
 0x167   : > { %v411_v13 = vpop.f32.mrb[0].mxu0 }
 0x168   : > { %v412_v15 = vadd.f32 %v411_v13, %v335_v12  ;;  %v543_v16 = vpop.f32.mrb[1].mxu0 }
 0x16a   : > { %v416_v17 = vadd.f32 %v415_v14, %v412_v15 }
 0x16c   : > { %417 = vst [vmem:[%s313_s29] sm:$0xff] %v416_v17 }
 0x16d PF: > { %s16_s25 = sadd.s32 1, %s627_s25   ;;  %s748_s21 = smov %s619_s23 }
 0x16e   : > { %p13_p7 = scmp.ge.s32.totalorder %s16_s25, 6   ;;  %s749_s22 = smov %s623_s24 }
 0x16f   : > { %s750_s23 = smov %s753_s26  ;;  %s751_s24 = smov %s757_s27 }
 0x170   :  { %15 = sbr.rel (!%p13_p7) target bundleno = 3 (0x3), region = 77 }

</bundles_post_ra>
